<compile_context>
chip_gen: v7x
topology: tpu7x:2x2x1
jax: 0.10.0
libtpu: 0.0.40
codegen_flags: <defaults>
</compile_context>

<pallas_src>
import jax
import jax.numpy as jnp
from jax.experimental import pallas as pl
from jax.experimental.pallas import tpu as pltpu


def _round_up(x, m):
    return ((x + m - 1) // m) * m


def _sepconv1d_kernel(x_ref, wdw_ref, bdw_ref, wpw_ref, bpw_ref, o_ref):
    """One lane-dense column tile per grid step.

    x_ref  : (K, ni, L_TILE)   pre-shifted/pre-strided depthwise taps
    wdw_ref: (ni, K)           depthwise weights (groups=ni, 1 in-ch each)
    bdw_ref: (ni, 1)           depthwise bias
    wpw_ref: (no_pad, ni)      pointwise (1x1 conv) weights (zero-padded rows)
    bpw_ref: (no_pad, 1)       pointwise bias
    o_ref  : (no_pad, L_TILE)
    """
    k_taps = x_ref.shape[0]
    wdw = wdw_ref[...].astype(jnp.float32)                      # tiny (ni, K)

    # Depthwise conv: per-tap fused multiply-add, pure per-lane VPU work.
    acc = x_ref[0].astype(jnp.float32) * wdw[:, 0:1]            # (ni, L_TILE)
    for k in range(1, k_taps):
        acc = acc + x_ref[k].astype(jnp.float32) * wdw[:, k:k + 1]
    acc = acc + bdw_ref[...].astype(jnp.float32)

    # Pointwise 1x1 conv == (no_pad, ni) x (ni, L_TILE) matmul on the MXU.
    # (On v6e/v7x, acc/wpw could be cast to bf16 here if precision allows.)
    out = jnp.dot(wpw_ref[...].astype(jnp.float32), acc,
                  preferred_element_type=jnp.float32)
    out = out + bpw_ref[...].astype(jnp.float32)
    o_ref[...] = out.astype(o_ref.dtype)


def _pick_tile(m, k, ni, no_pad, tile_hint):
    """Lane-dense tile: multiple of 128, capped by a double-buffer VMEM budget."""
    t = max(128, _round_up(min(tile_hint, m), 128))
    budget = 24 * 1024 * 1024                 # conservative: fits v7x scoped VMEM
    bytes_per_col = 2 * (k * ni + no_pad) * 4  # double-buffered f32 in + out tiles
    while t > 128 and t * bytes_per_col > budget:
        t -= 128
    return t


def sep_conv1d(x, w_dw, b_dw, w_pw, b_pw, *, stride, pad, tile=512):
    """x: (N, ni, L); w_dw: (ni, 1, K); b_dw: (ni,); w_pw: (no, ni, 1); b_pw: (no,)."""
    N, ni, L = x.shape
    no = w_pw.shape[0]
    K = w_dw.shape[-1]
    L_out = (L + 2 * pad - K) // stride + 1
    M = N * L_out

    # ---- wrapper-side layout plumbing (plain XLA) ----
    x_p = jnp.pad(x, ((0, 0), (0, 0), (pad, pad)))
    # One contiguous slab per kernel tap: handles halo and stride outside the
    # kernel, so the kernel only ever sees contiguous, lane-aligned data.
    span = stride * (L_out - 1) + 1
    taps = [jax.lax.slice(x_p, (0, 0, k), (N, ni, k + span), (1, 1, stride))
            for k in range(K)]                       # K x (N, ni, L_out)
    taps = jnp.stack(taps, axis=0)                   # (K, N, ni, L_out)
    # Fold batch into the length (lane) axis -> wide MXU N dim, dense stores.
    taps = taps.transpose(0, 2, 1, 3).reshape(K, ni, M)

    no_pad = _round_up(no, 8)                        # sublane-aligned output rows
    l_tile = _pick_tile(M, K, ni, no_pad, tile)
    M_pad = _round_up(M, l_tile)
    taps = jnp.pad(taps, ((0, 0), (0, 0), (0, M_pad - M)))

    wdw2 = w_dw.reshape(ni, K)
    bdw2 = b_dw.reshape(ni, 1)
    wpw2 = jnp.pad(w_pw.reshape(no, ni), ((0, no_pad - no), (0, 0)))
    bpw2 = jnp.pad(b_pw.reshape(no, 1), ((0, no_pad - no), (0, 0)))

    out_flat = pl.pallas_call(
        _sepconv1d_kernel,
        out_shape=jax.ShapeDtypeStruct((no_pad, M_pad), x.dtype),
        grid=(M_pad // l_tile,),
        in_specs=[
            pl.BlockSpec((K, ni, l_tile), lambda i: (0, 0, i)),
            pl.BlockSpec((ni, K), lambda i: (0, 0)),
            pl.BlockSpec((ni, 1), lambda i: (0, 0)),
            pl.BlockSpec((no_pad, ni), lambda i: (0, 0)),
            pl.BlockSpec((no_pad, 1), lambda i: (0, 0)),
        ],
        out_specs=pl.BlockSpec((no_pad, l_tile), lambda i: (0, i)),
        compiler_params=pltpu.CompilerParams(
            dimension_semantics=("parallel",)),
    )(taps, wdw2, bdw2, wpw2, bpw2)

    # Un-flatten: (no_pad, N*L_out) -> (N, no, L_out)
    return out_flat[:no, :M].reshape(no, N, L_out).transpose(1, 0, 2)


def _reference_sepconv(x, w_dw, b_dw, w_pw, b_pw, stride, pad):
    y = jax.lax.conv_general_dilated(
        x, w_dw, window_strides=(stride,), padding=[(pad, pad)],
        dimension_numbers=('NCH', 'OIH', 'NCH'),
        feature_group_count=x.shape[1])
    y = y + b_dw[None, :, None]
    z = jax.lax.conv_general_dilated(
        y, w_pw, window_strides=(1,), padding=[(0, 0)],
        dimension_numbers=('NCH', 'OIH', 'NCH'))
    return z + b_pw[None, :, None]


if __name__ == "__main__":
    # _SepConv1d(ni=4, no=8, kernel=3, stride, pad=1), batch=2, length=16
    N, ni, no, L, K, pad = 2, 4, 8, 16, 3, 1

    key = jax.random.PRNGKey(0)
    kx, kw1, kb1, kw2, kb2 = jax.random.split(key, 5)
    x = jax.random.normal(kx, (N, ni, L), jnp.float32)
    w_dw = jax.random.normal(kw1, (ni, 1, K), jnp.float32) * 0.3   # depthwise weight
    b_dw = jax.random.normal(kb1, (ni,), jnp.float32) * 0.1        # depthwise bias
    w_pw = jax.random.normal(kw2, (no, ni, 1), jnp.float32) * 0.3  # pointwise weight
    b_pw = jax.random.normal(kb2, (no,), jnp.float32) * 0.1        # pointwise bias

    for stride in (1, 2):   # exercise both the unit-stride and strided paths
        out = sep_conv1d(x, w_dw, b_dw, w_pw, b_pw, stride=stride, pad=pad)
        out = jax.block_until_ready(out)
        ref = _reference_sepconv(x, w_dw, b_dw, w_pw, b_pw, stride, pad)
        L_out = (L + 2 * pad - K) // stride + 1
        assert out.shape == ref.shape == (N, no, L_out), (out.shape, ref.shape)
        assert jnp.allclose(out, ref, atol=1e-5, rtol=1e-5), \
            f"stride={stride} max err {jnp.max(jnp.abs(out - ref))}"

    print("KERNEL_OK")
</pallas_src>

<mosaic_0001>
module attributes {stable_mosaic.version = 11 : i64} {
  func.func @_sepconv1d_kernel(%arg0: i32, %arg1: memref<3x4x128xf32, #tpu.memory_space<vmem>>, %arg2: memref<4x3xf32, #tpu.memory_space<vmem>>, %arg3: memref<4x1xf32, #tpu.memory_space<vmem>>, %arg4: memref<8x4xf32, #tpu.memory_space<vmem>>, %arg5: memref<8x1xf32, #tpu.memory_space<vmem>>, %arg6: memref<8x128xf32, #tpu.memory_space<vmem>>) attributes {dimension_semantics = [#tpu.dimension_semantics<parallel>], iteration_bounds = array<i64: 1>, scalar_prefetch = 0 : i64, scratch_operands = 0 : i64, tpu.core_type = #tpu.core_type<tc>, window_params = [{transform_indices = @transform_0, window_bounds = array<i64: 3, 4, 128>}, {pipeline_mode = #tpu.pipeline_mode<synchronous>, transform_indices = @transform_1, window_bounds = array<i64: 4, 3>}, {pipeline_mode = #tpu.pipeline_mode<synchronous>, transform_indices = @transform_2, window_bounds = array<i64: 4, 1>}, {pipeline_mode = #tpu.pipeline_mode<synchronous>, transform_indices = @transform_3, window_bounds = array<i64: 8, 4>}, {pipeline_mode = #tpu.pipeline_mode<synchronous>, transform_indices = @transform_4, window_bounds = array<i64: 8, 1>}, {transform_indices = @transform_5, window_bounds = array<i64: 8, 128>}]} {
    %c0 = arith.constant 0 : index
    %c0_0 = arith.constant 0 : index
    %0 = vector.load %arg2[%c0, %c0_0] : memref<4x3xf32, #tpu.memory_space<vmem>>, vector<4x3xf32>
    %c0_1 = arith.constant 0 : index
    %c0_2 = arith.constant 0 : index
    %c0_3 = arith.constant 0 : index
    %1 = vector.load %arg1[%c0_1, %c0_2, %c0_3] : memref<3x4x128xf32, #tpu.memory_space<vmem>>, vector<1x4x128xf32>
    %2 = vector.shape_cast %1 : vector<1x4x128xf32> to vector<4x128xf32>
    %3 = vector.extract_strided_slice %0 {offsets = [0, 0], sizes = [4, 1], strides = [1, 1]} : vector<4x3xf32> to vector<4x1xf32>
    %4 = vector.broadcast %3 : vector<4x1xf32> to vector<4x128xf32>
    %5 = arith.mulf %2, %4 : vector<4x128xf32>
    %c1 = arith.constant 1 : index
    %c0_4 = arith.constant 0 : index
    %c0_5 = arith.constant 0 : index
    %6 = vector.load %arg1[%c1, %c0_4, %c0_5] : memref<3x4x128xf32, #tpu.memory_space<vmem>>, vector<1x4x128xf32>
    %7 = vector.shape_cast %6 : vector<1x4x128xf32> to vector<4x128xf32>
    %8 = vector.extract_strided_slice %0 {offsets = [0, 1], sizes = [4, 1], strides = [1, 1]} : vector<4x3xf32> to vector<4x1xf32>
    %9 = vector.broadcast %8 : vector<4x1xf32> to vector<4x128xf32>
    %10 = arith.mulf %7, %9 : vector<4x128xf32>
    %11 = arith.addf %5, %10 : vector<4x128xf32>
    %c2 = arith.constant 2 : index
    %c0_6 = arith.constant 0 : index
    %c0_7 = arith.constant 0 : index
    %12 = vector.load %arg1[%c2, %c0_6, %c0_7] : memref<3x4x128xf32, #tpu.memory_space<vmem>>, vector<1x4x128xf32>
    %13 = vector.shape_cast %12 : vector<1x4x128xf32> to vector<4x128xf32>
    %14 = vector.extract_strided_slice %0 {offsets = [0, 2], sizes = [4, 1], strides = [1, 1]} : vector<4x3xf32> to vector<4x1xf32>
    %15 = vector.broadcast %14 : vector<4x1xf32> to vector<4x128xf32>
    %16 = arith.mulf %13, %15 : vector<4x128xf32>
    %17 = arith.addf %11, %16 : vector<4x128xf32>
    %c0_8 = arith.constant 0 : index
    %c0_9 = arith.constant 0 : index
    %18 = vector.load %arg3[%c0_8, %c0_9] : memref<4x1xf32, #tpu.memory_space<vmem>>, vector<4x1xf32>
    %19 = vector.broadcast %18 : vector<4x1xf32> to vector<4x128xf32>
    %20 = arith.addf %17, %19 : vector<4x128xf32>
    %c0_10 = arith.constant 0 : index
    %c0_11 = arith.constant 0 : index
    %21 = vector.load %arg4[%c0_10, %c0_11] : memref<8x4xf32, #tpu.memory_space<vmem>>, vector<8x4xf32>
    %cst = arith.constant dense<0.000000e+00> : vector<8x128xf32>
    %22 = tpu.matmul %21, %20, %cst {dimension_numbers = #tpu.dot_dimension_numbers<[1], [0], [0], [1], [0, 0, 1, 1], [], []>} : vector<8x4xf32>, vector<4x128xf32>, vector<8x128xf32> -> vector<8x128xf32>
    %c0_12 = arith.constant 0 : index
    %c0_13 = arith.constant 0 : index
    %23 = vector.load %arg5[%c0_12, %c0_13] : memref<8x1xf32, #tpu.memory_space<vmem>>, vector<8x1xf32>
    %24 = vector.broadcast %23 : vector<8x1xf32> to vector<8x128xf32>
    %25 = arith.addf %22, %24 : vector<8x128xf32>
    %c0_14 = arith.constant 0 : index
    %c0_15 = arith.constant 0 : index
    %26 = vector.load %arg6[%c0_14, %c0_15] : memref<8x128xf32, #tpu.memory_space<vmem>>, vector<8x128xf32>
    tpu.vector_store %arg6[%c0_14, %c0_15], %25 {strides = array<i32>} : memref<8x128xf32, #tpu.memory_space<vmem>>, vector<8x128xf32>,
    return
  }
  func.func @transform_0(%arg0: i32) -> (i32, i32, i32) {
    %c0_i32 = arith.constant 0 : i32
    %c0_i32_0 = arith.constant 0 : i32
    %c0_i32_1 = arith.constant 0 : i32
    return %c0_i32, %c0_i32_0, %arg0 : i32, i32, i32
  }
  func.func @transform_1(%arg0: i32) -> (i32, i32) {
    %c0_i32 = arith.constant 0 : i32
    %c0_i32_0 = arith.constant 0 : i32
    %c0_i32_1 = arith.constant 0 : i32
    return %c0_i32, %c0_i32_0 : i32, i32
  }
  func.func @transform_2(%arg0: i32) -> (i32, i32) {
    %c0_i32 = arith.constant 0 : i32
    %c0_i32_0 = arith.constant 0 : i32
    %c0_i32_1 = arith.constant 0 : i32
    return %c0_i32, %c0_i32_0 : i32, i32
  }
  func.func @transform_3(%arg0: i32) -> (i32, i32) {
    %c0_i32 = arith.constant 0 : i32
    %c0_i32_0 = arith.constant 0 : i32
    %c0_i32_1 = arith.constant 0 : i32
    return %c0_i32, %c0_i32_0 : i32, i32
  }
  func.func @transform_4(%arg0: i32) -> (i32, i32) {
    %c0_i32 = arith.constant 0 : i32
    %c0_i32_0 = arith.constant 0 : i32
    %c0_i32_1 = arith.constant 0 : i32
    return %c0_i32, %c0_i32_0 : i32, i32
  }
  func.func @transform_5(%arg0: i32) -> (i32, i32) {
    %c0_i32 = arith.constant 0 : i32
    %c0_i32_0 = arith.constant 0 : i32
    return %c0_i32, %arg0 : i32, i32
  }
}

</mosaic_0001>

<bundles_post_ra>
// kernel: tpu_custom_call.1
= control target key start
LH: loop header
LB: loop body
LE: loop exit
PB: predicated region body
PF: predicated region fallthrough
CT: control target
= control target key end

     0   :  { %v198_v1 = vmov 0   ;;  %v199_v2 = vmov 2   ;;  %s267_s0 = inlined_call_operand.vmem [shape: f32[3,4,128], index: 0, kind: input, shape index: {}]   ;;  %s268_s1 = inlined_call_operand.vmem [shape: f32[4,3], index: 1, kind: input, shape index: {}]   ;;  %s269_s2 = inlined_call_operand.vmem [shape: f32[4,1], index: 2, kind: input, shape index: {}]   ;;  %s270_s3 = inlined_call_operand.vmem [shape: f32[8,4], index: 3, kind: input, shape index: {}]   ;;  %s271_s4 = inlined_call_operand.vmem [shape: f32[8,1], index: 4, kind: input, shape index: {}]   ;;  %s272_s5 = inlined_call_operand.hbm [shape: f32[8,128], index: 5, kind: output, shape index: {}]  }
   0x1   :  { %v21_v0 = vld [vmem:[%s268_s1] sm:$0xf]  ;;  %169 = vset.pattern.permute.xlu0 %v198_v1  ;;  %171 = vset.pattern.permute.xlu1 %v199_v2 }
   0x2   :  { %10 = vsyncpa [#allocation3], 0  ;;  %25 = vperm.xlu0 %169, %v21_v0   ;;  %40 = vperm.xlu1 %171, %v21_v0   ;;  %v45_v3 = vld [vmem:[%s269_s2] sm:$0xf]  ;;  %v200_v4 = vmov 1   ;;  %v201_v6 = vmov 0.0  }
   0x3   :  { %v53_v5 = vld [vmem:[%s271_s4] sm:$0xff]  ;;  %158 = vmatprep.subr.mxu0 %v201_v6  ;;  %vm202_vm0 = vmmov 0   ;;  %v153_v9 = vld [vmem:[%s267_s0 + $0x8] sm:$0xf]  ;;  %vm63_vm1 = vcmask 1043456   ;;  %vm59_vm2 = vcmask 31744  }
   0x4   :  { %160 = vmatprep.mubr.msk.f32.mxu0 %vm202_vm0, %v201_v6  ;;  %v22_v8 = vld [vmem:[%s267_s0] sm:$0xf]  ;;  %v152_v10 = vld [vmem:[%s267_s0 + $0x4] sm:$0xf]  ;;  %s203_s29 = smov [#allocation2]  }
   0x5   :  { %v52_v20 = vld [vmem:[%s270_s3] sm:$0xff]  ;;  %s144_s30 = sshll.u32 %s203_s29, 4  ;;  %s145_s30 = int_to_ptr.vmem [resolvable:$true] %s144_s30 }
   0x6   :  { %170 = vset.pattern.permute.xlu0 %v200_v4  ;;  %172 = vset.pattern.permute.xlu1 %v198_v1  ;;  %s174_s0 = scalar_lea.vmem %s145_s30, 128  ;;  %p179_p1 = scmp.lt.s32.totalorder %s145_s30, %s145_s30 }
   0x7   :  { %32 = vperm.xlu0 %170, %v21_v0   ;;  %48 = vperm.xlu1 %172, %v45_v3   ;;  %p175_p0 = scmp.ne.s32.totalorder %s145_s30, %s174_s0  ;;  %p180_p2 = scmp.lt.s32.totalorder %s174_s0, %s174_s0 }
   0x9   :  { %p181_p3 = por %p180_p2, %p179_p1 }
   0xb   :  { %56 = vperm.xlu1 %172, %v53_v5   ;;  %173 = vset.pattern.permute.xlu0 %v198_v1  ;;  %p182_p4 = pnand %p181_p3, %p175_p0 }
  0x81   :  { %v26_v7 = vpop.permute.xlu0 %25  ;;  %v41_v11 = vpop.permute.xlu1 %40 }
  0x82   :  { %v28_v13 = vmul.f32 %v26_v7, %v22_v8  ;;  %v43_v14 = vmul.f32 %v153_v9, %v41_v11 }
  0x86   :  { %v33_v12 = vpop.permute.xlu0 %32  ;;  %v49_v18 = vpop.permute.xlu1 %48 }
  0x87   :  { %v35_v15 = vmul.f32 %v152_v10, %v33_v12 }
  0x89   :  { %v36_v16 = vadd.f32 %v35_v15, %v28_v13 }
  0x8a   :  { %v57_v21 = vpop.permute.xlu1 %56 }
  0x8b   :  { %v44_v17 = vadd.f32 %v43_v14, %v36_v16 }
  0x8d   :  { %v51_v19 = vadd.f32 %v49_v18, %v44_v17 }
  0x8f   :  { %159 = vmatpush3.msk.msra.mxu0 %vm63_vm1, %v51_v19 }
  0x90   :  { %161 = vmatmul.mubr.msk.f32.vlgmr.msra.gmra.mrb[0].mxu0 %vm59_vm2, %v52_v20 }
 0x163   :  { %v133_v22 = vpop.f32.mrb[0].mxu0 }
 0x164   :  { %v134_v23 = vadd.f32 %v133_v22, %v57_v21  ;;  %v162_v24 = vpop.f32.mrb[1].mxu0 }
 0x166   :  { %137 = vst [vmem:[#allocation2] sm:$0xff] %v134_v23 }
 0x167   :  { %185 = shalt.err (!%p182_p4)
}
 0x168   :  { %s186_s7 = scalar_lea.hbm %s272_s5, 128 }
 0x169   :  { %p187_p5 = scmp.ne.s32.totalorder %s272_s5, %s186_s7  ;;  %p190_p6 = scmp.lt.u32.totalorder %s186_s7, %s272_s5 }
 0x16b   :  { %p192_p7 = pnand %p190_p6, %p187_p5 }
 0x16d   :  { %195 = shalt.err (!%p192_p7)
}
 0x16e   :  { %147 = dma.vmem_to_hbm [thread:$0]  %s145_s30, 128, %s272_s5, [#allocation3]  }
 0x16f   :  { %196 = dma.done.wait [#allocation3], 128  }
 0x170   :  { %197 = vsyncadd [#allocation3], 4294967168 }
 0x171   :  { %151 = vsyncpa [#allocation3], 1 }

</bundles_post_ra>
